<compile_context>
chip_gen: v7x
topology: tpu7x:2x2x1
jax: 0.10.0
libtpu: 0.0.40
codegen_flags: <defaults>
</compile_context>

<pallas_src>
import functools
from math import pi, sqrt

import numpy as np
import jax
import jax.numpy as jnp
from jax.experimental import pallas as pl
from jax.experimental.pallas import tpu as pltpu


def _fourier_kernel(freq_ref, x_ref, out_ref, *, order: int, use_recurrence: bool):
    """Per-tile kernel.

    freq_ref: SMEM (order,) f32    — consumed as scalars.
    x_ref   : VMEM (TB, F)         — F on the lane axis.
    out_ref : VMEM (K, TB, F)      — K = 1 + 2*order on a leading (non-lane) axis.
    """
    x = x_ref[...]                                    # (TB, F) f32
    inv_sqrt_pi = jnp.float32(1.0 / sqrt(pi))
    const0 = jnp.float32((1.0 / sqrt(2.0)) / sqrt(pi))

    # Constant plane, written once per tile as a full lane-dense slab store.
    out_ref[0] = jnp.full(x.shape, const0, dtype=out_ref.dtype)

    if use_recurrence:
        # sin(kx)/cos(kx) by angle addition: 2 EUP ops per tile instead of
        # 2*order; the extra FMAs ride the VPU, which has slack in this
        # store-bound kernel.
        s1 = jnp.sin(x)
        c1 = jnp.cos(x)
        s_k, c_k = s1, c1
        out_ref[1] = (s1 * inv_sqrt_pi).astype(out_ref.dtype)
        out_ref[1 + order] = (c1 * inv_sqrt_pi).astype(out_ref.dtype)
        for k in range(1, order):                     # static unroll (order is small)
            s_next = s_k * c1 + c_k * s1
            c_next = c_k * c1 - s_k * s1
            out_ref[1 + k] = (s_next * inv_sqrt_pi).astype(out_ref.dtype)
            out_ref[1 + order + k] = (c_next * inv_sqrt_pi).astype(out_ref.dtype)
            s_k, c_k = s_next, c_next
    else:
        for k in range(order):                        # static unroll
            f_k = freq_ref[k]                         # scalar from SMEM
            arg = x * f_k
            out_ref[1 + k] = (jnp.sin(arg) * inv_sqrt_pi).astype(out_ref.dtype)
            out_ref[1 + order + k] = (jnp.cos(arg) * inv_sqrt_pi).astype(out_ref.dtype)


def _pick_block_rows(B: int, F: int, K: int) -> int:
    """Rows per tile: ~2 MiB of output per pipeline buffer (fits double-buffered
    on v7x's 64 MiB VMEM / 32 MiB scoped default; large enough to amortize the
    ~0.35 us/step grid overhead and hit the HBM-write roofline on v5e/v6e)."""
    target_bytes = 2 * 1024 * 1024
    tb = max(1, target_bytes // (F * K * 4))
    if tb >= B:
        return B                     # single block: full-array dims, no (8,128) rule
    return max(8, (tb // 8) * 8)     # multi-block: second-minor dim must be 8-aligned


def _is_default_frequencies(frequencies) -> bool:
    """True iff frequencies is a *concrete* array equal to arange(1, order+1)
    (the module's non-learnable default), making the recurrence path valid."""
    try:
        f = np.asarray(frequencies)   # raises for traced values
    except Exception:
        return False
    if f.ndim != 1 or f.size == 0:
        return False
    return bool(np.array_equal(f, np.arange(1, f.shape[0] + 1, dtype=f.dtype)))


def fourier_expansion(x: jax.Array,
                      frequencies: jax.Array,
                      *,
                      use_recurrence: bool | None = None,
                      block_rows: int | None = None,
                      layout: str = "bfk",
                      out_dtype=None) -> jax.Array:
    """x: (B, F); frequencies: (order,).

    layout: "bfk" (default) returns (B, F, 1+2*order) matching PyTorch;
            "kbf" returns (1+2*order, B, F) and skips the wrapper permute
            (saves one full HBM pass over the (K x)-sized output).
    use_recurrence: None = auto (enabled only for concrete default frequencies
                    1..order); True/False forces it.
    out_dtype:      e.g. jnp.bfloat16 to halve HBM write traffic if the
                    consumer tolerates it (math stays f32 in-kernel).
    """
    assert layout in ("bfk", "kbf")
    B, F = x.shape
    order = int(frequencies.shape[0])
    K = 1 + 2 * order
    out_dtype = x.dtype if out_dtype is None else out_dtype

    if use_recurrence is None:
        use_recurrence = _is_default_frequencies(frequencies)

    tb = _pick_block_rows(B, F, K) if block_rows is None else min(B, block_rows)
    num_blocks = pl.cdiv(B, tb)
    Bp = num_blocks * tb
    if Bp != B:
        x = jnp.pad(x, ((0, Bp - B), (0, 0)))

    out_kbf = pl.pallas_call(
        functools.partial(_fourier_kernel, order=order,
                          use_recurrence=use_recurrence),
        out_shape=jax.ShapeDtypeStruct((K, Bp, F), out_dtype),
        grid=(num_blocks,),
        in_specs=[
            # frequencies: tiny table, whole array in SMEM, read as scalars.
            pl.BlockSpec(memory_space=pltpu.MemorySpace.SMEM),
            # x: one row-tile per grid step, F on the lane axis.
            pl.BlockSpec((tb, F), lambda i: (i, 0)),
        ],
        # output: all K harmonic slabs for this row-tile, lane-dense in F.
        out_specs=pl.BlockSpec((K, tb, F), lambda i: (0, i, 0)),
        compiler_params=pltpu.CompilerParams(
            # row tiles are independent -> shard across both TCs on v7x.
            dimension_semantics=("parallel",),
        ),
    )(frequencies.astype(jnp.float32), x)

    if layout == "kbf":
        # TODO(synk): preferred when the downstream consumer can take (K, B, F):
        # drops the XLA permute and its extra HBM read+write of the K x-sized output.
        return out_kbf[:, :B] if Bp != B else out_kbf

    # Cheap layout permute in the wrapper to match the PyTorch (B, F, K) output.
    out = jnp.transpose(out_kbf, (1, 2, 0))
    if Bp != B:
        out = out[:B]
    return out


def fourier_expansion_ref(x: jax.Array, frequencies: jax.Array) -> jax.Array:
    """Pure-JAX reference mirroring the PyTorch forward, for verification."""
    tmp = jnp.einsum("bi,j->bij", x, frequencies)
    const = jnp.full(x.shape + (1,), 1.0 / jnp.sqrt(2.0), dtype=x.dtype)
    out = jnp.concatenate([const, jnp.sin(tmp), jnp.cos(tmp)], axis=-1)
    return out / jnp.sqrt(jnp.float32(pi))


if __name__ == "__main__":
    ORDER = 5          # module default
    BATCH, FEAT = 2, 16

    key = jax.random.PRNGKey(0)
    # angle-like features in [0, 2*pi)
    x = jax.random.uniform(key, (BATCH, FEAT), dtype=jnp.float32) * (2.0 * pi)

    # Deterministic "parameter" init identical to the module's buffer:
    # frequencies = arange(1, order + 1)
    frequencies = jnp.arange(1, ORDER + 1, dtype=jnp.float32)

    ref = fourier_expansion_ref(x, frequencies)

    # Auto path: recurrence enabled (default integer frequencies detected).
    out = jax.block_until_ready(fourier_expansion(x, frequencies))
    assert out.shape == (BATCH, FEAT, 1 + 2 * ORDER), out.shape
    assert jnp.allclose(out, ref, atol=1e-5, rtol=1e-5), "mismatch vs reference"

    # Forced direct sin/cos path (valid for any, e.g. learnable, frequencies).
    out_direct = jax.block_until_ready(
        fourier_expansion(x, frequencies, use_recurrence=False))
    assert jnp.allclose(out_direct, ref, atol=1e-5, rtol=1e-5), "direct mismatch"

    # Transpose-free (K, B, F) layout.
    out_kbf = jax.block_until_ready(
        fourier_expansion(x, frequencies, layout="kbf"))
    assert out_kbf.shape == (1 + 2 * ORDER, BATCH, FEAT), out_kbf.shape
    assert jnp.allclose(jnp.transpose(out_kbf, (1, 2, 0)), ref,
                        atol=1e-5, rtol=1e-5), "kbf mismatch"

    print("KERNEL_OK")
</pallas_src>

<mosaic_0001>
module attributes {stable_mosaic.version = 11 : i64} {
  func.func @_fourier_kernel(%arg0: i32, %arg1: memref<5xf32, #tpu.memory_space<smem>>, %arg2: memref<2x16xf32, #tpu.memory_space<vmem>>, %arg3: memref<11x2x16xf32, #tpu.memory_space<vmem>>) attributes {dimension_semantics = [#tpu.dimension_semantics<parallel>], iteration_bounds = array<i64: 1>, scalar_prefetch = 0 : i64, scratch_operands = 0 : i64, tpu.core_type = #tpu.core_type<tc>, window_params = [{transform_indices = @transform_0, window_bounds = array<i64: 5>}, {transform_indices = @transform_1, window_bounds = array<i64: 2, 16>}, {transform_indices = @transform_2, window_bounds = array<i64: 11, 2, 16>}]} {
    %c0 = arith.constant 0 : index
    %c0_0 = arith.constant 0 : index
    %0 = vector.load %arg2[%c0, %c0_0] : memref<2x16xf32, #tpu.memory_space<vmem>>, vector<2x16xf32>
    %cst = arith.constant 0.398942292 : f32
    %1 = vector.broadcast %cst : f32 to vector<2x16xf32>
    %c0_1 = arith.constant 0 : index
    %c0_2 = arith.constant 0 : index
    %c0_3 = arith.constant 0 : index
    %2 = vector.load %arg3[%c0_1, %c0_2, %c0_3] : memref<11x2x16xf32, #tpu.memory_space<vmem>>, vector<1x2x16xf32>
    %3 = vector.shape_cast %2 : vector<1x2x16xf32> to vector<2x16xf32>
    %4 = vector.shape_cast %1 : vector<2x16xf32> to vector<1x2x16xf32>
    tpu.vector_store %arg3[%c0_1, %c0_2, %c0_3], %4 {strides = array<i32>} : memref<11x2x16xf32, #tpu.memory_space<vmem>>, vector<1x2x16xf32>,
    %5 = math.sin %0 : vector<2x16xf32>
    %6 = math.cos %0 : vector<2x16xf32>
    %cst_4 = arith.constant 0.564189613 : f32
    %7 = vector.broadcast %cst_4 : f32 to vector<2x16xf32>
    %8 = arith.mulf %5, %7 : vector<2x16xf32>
    %c1 = arith.constant 1 : index
    %c0_5 = arith.constant 0 : index
    %c0_6 = arith.constant 0 : index
    %9 = vector.load %arg3[%c1, %c0_5, %c0_6] : memref<11x2x16xf32, #tpu.memory_space<vmem>>, vector<1x2x16xf32>
    %10 = vector.shape_cast %9 : vector<1x2x16xf32> to vector<2x16xf32>
    %11 = vector.shape_cast %8 : vector<2x16xf32> to vector<1x2x16xf32>
    tpu.vector_store %arg3[%c1, %c0_5, %c0_6], %11 {strides = array<i32>} : memref<11x2x16xf32, #tpu.memory_space<vmem>>, vector<1x2x16xf32>,
    %cst_7 = arith.constant 0.564189613 : f32
    %12 = vector.broadcast %cst_7 : f32 to vector<2x16xf32>
    %13 = arith.mulf %6, %12 : vector<2x16xf32>
    %c6 = arith.constant 6 : index
    %c0_8 = arith.constant 0 : index
    %c0_9 = arith.constant 0 : index
    %14 = vector.load %arg3[%c6, %c0_8, %c0_9] : memref<11x2x16xf32, #tpu.memory_space<vmem>>, vector<1x2x16xf32>
    %15 = vector.shape_cast %14 : vector<1x2x16xf32> to vector<2x16xf32>
    %16 = vector.shape_cast %13 : vector<2x16xf32> to vector<1x2x16xf32>
    tpu.vector_store %arg3[%c6, %c0_8, %c0_9], %16 {strides = array<i32>} : memref<11x2x16xf32, #tpu.memory_space<vmem>>, vector<1x2x16xf32>,
    %17 = arith.mulf %5, %6 : vector<2x16xf32>
    %18 = arith.mulf %6, %5 : vector<2x16xf32>
    %19 = arith.addf %17, %18 : vector<2x16xf32>
    %20 = arith.mulf %6, %6 : vector<2x16xf32>
    %21 = arith.mulf %5, %5 : vector<2x16xf32>
    %22 = arith.subf %20, %21 : vector<2x16xf32>
    %cst_10 = arith.constant 0.564189613 : f32
    %23 = vector.broadcast %cst_10 : f32 to vector<2x16xf32>
    %24 = arith.mulf %19, %23 : vector<2x16xf32>
    %c2 = arith.constant 2 : index
    %c0_11 = arith.constant 0 : index
    %c0_12 = arith.constant 0 : index
    %25 = vector.load %arg3[%c2, %c0_11, %c0_12] : memref<11x2x16xf32, #tpu.memory_space<vmem>>, vector<1x2x16xf32>
    %26 = vector.shape_cast %25 : vector<1x2x16xf32> to vector<2x16xf32>
    %27 = vector.shape_cast %24 : vector<2x16xf32> to vector<1x2x16xf32>
    tpu.vector_store %arg3[%c2, %c0_11, %c0_12], %27 {strides = array<i32>} : memref<11x2x16xf32, #tpu.memory_space<vmem>>, vector<1x2x16xf32>,
    %cst_13 = arith.constant 0.564189613 : f32
    %28 = vector.broadcast %cst_13 : f32 to vector<2x16xf32>
    %29 = arith.mulf %22, %28 : vector<2x16xf32>
    %c7 = arith.constant 7 : index
    %c0_14 = arith.constant 0 : index
    %c0_15 = arith.constant 0 : index
    %30 = vector.load %arg3[%c7, %c0_14, %c0_15] : memref<11x2x16xf32, #tpu.memory_space<vmem>>, vector<1x2x16xf32>
    %31 = vector.shape_cast %30 : vector<1x2x16xf32> to vector<2x16xf32>
    %32 = vector.shape_cast %29 : vector<2x16xf32> to vector<1x2x16xf32>
    tpu.vector_store %arg3[%c7, %c0_14, %c0_15], %32 {strides = array<i32>} : memref<11x2x16xf32, #tpu.memory_space<vmem>>, vector<1x2x16xf32>,
    %33 = arith.mulf %19, %6 : vector<2x16xf32>
    %34 = arith.mulf %22, %5 : vector<2x16xf32>
    %35 = arith.addf %33, %34 : vector<2x16xf32>
    %36 = arith.mulf %22, %6 : vector<2x16xf32>
    %37 = arith.mulf %19, %5 : vector<2x16xf32>
    %38 = arith.subf %36, %37 : vector<2x16xf32>
    %cst_16 = arith.constant 0.564189613 : f32
    %39 = vector.broadcast %cst_16 : f32 to vector<2x16xf32>
    %40 = arith.mulf %35, %39 : vector<2x16xf32>
    %c3 = arith.constant 3 : index
    %c0_17 = arith.constant 0 : index
    %c0_18 = arith.constant 0 : index
    %41 = vector.load %arg3[%c3, %c0_17, %c0_18] : memref<11x2x16xf32, #tpu.memory_space<vmem>>, vector<1x2x16xf32>
    %42 = vector.shape_cast %41 : vector<1x2x16xf32> to vector<2x16xf32>
    %43 = vector.shape_cast %40 : vector<2x16xf32> to vector<1x2x16xf32>
    tpu.vector_store %arg3[%c3, %c0_17, %c0_18], %43 {strides = array<i32>} : memref<11x2x16xf32, #tpu.memory_space<vmem>>, vector<1x2x16xf32>,
    %cst_19 = arith.constant 0.564189613 : f32
    %44 = vector.broadcast %cst_19 : f32 to vector<2x16xf32>
    %45 = arith.mulf %38, %44 : vector<2x16xf32>
    %c8 = arith.constant 8 : index
    %c0_20 = arith.constant 0 : index
    %c0_21 = arith.constant 0 : index
    %46 = vector.load %arg3[%c8, %c0_20, %c0_21] : memref<11x2x16xf32, #tpu.memory_space<vmem>>, vector<1x2x16xf32>
    %47 = vector.shape_cast %46 : vector<1x2x16xf32> to vector<2x16xf32>
    %48 = vector.shape_cast %45 : vector<2x16xf32> to vector<1x2x16xf32>
    tpu.vector_store %arg3[%c8, %c0_20, %c0_21], %48 {strides = array<i32>} : memref<11x2x16xf32, #tpu.memory_space<vmem>>, vector<1x2x16xf32>,
    %49 = arith.mulf %35, %6 : vector<2x16xf32>
    %50 = arith.mulf %38, %5 : vector<2x16xf32>
    %51 = arith.addf %49, %50 : vector<2x16xf32>
    %52 = arith.mulf %38, %6 : vector<2x16xf32>
    %53 = arith.mulf %35, %5 : vector<2x16xf32>
    %54 = arith.subf %52, %53 : vector<2x16xf32>
    %cst_22 = arith.constant 0.564189613 : f32
    %55 = vector.broadcast %cst_22 : f32 to vector<2x16xf32>
    %56 = arith.mulf %51, %55 : vector<2x16xf32>
    %c4 = arith.constant 4 : index
    %c0_23 = arith.constant 0 : index
    %c0_24 = arith.constant 0 : index
    %57 = vector.load %arg3[%c4, %c0_23, %c0_24] : memref<11x2x16xf32, #tpu.memory_space<vmem>>, vector<1x2x16xf32>
    %58 = vector.shape_cast %57 : vector<1x2x16xf32> to vector<2x16xf32>
    %59 = vector.shape_cast %56 : vector<2x16xf32> to vector<1x2x16xf32>
    tpu.vector_store %arg3[%c4, %c0_23, %c0_24], %59 {strides = array<i32>} : memref<11x2x16xf32, #tpu.memory_space<vmem>>, vector<1x2x16xf32>,
    %cst_25 = arith.constant 0.564189613 : f32
    %60 = vector.broadcast %cst_25 : f32 to vector<2x16xf32>
    %61 = arith.mulf %54, %60 : vector<2x16xf32>
    %c9 = arith.constant 9 : index
    %c0_26 = arith.constant 0 : index
    %c0_27 = arith.constant 0 : index
    %62 = vector.load %arg3[%c9, %c0_26, %c0_27] : memref<11x2x16xf32, #tpu.memory_space<vmem>>, vector<1x2x16xf32>
    %63 = vector.shape_cast %62 : vector<1x2x16xf32> to vector<2x16xf32>
    %64 = vector.shape_cast %61 : vector<2x16xf32> to vector<1x2x16xf32>
    tpu.vector_store %arg3[%c9, %c0_26, %c0_27], %64 {strides = array<i32>} : memref<11x2x16xf32, #tpu.memory_space<vmem>>, vector<1x2x16xf32>,
    %65 = arith.mulf %51, %6 : vector<2x16xf32>
    %66 = arith.mulf %54, %5 : vector<2x16xf32>
    %67 = arith.addf %65, %66 : vector<2x16xf32>
    %68 = arith.mulf %54, %6 : vector<2x16xf32>
    %69 = arith.mulf %51, %5 : vector<2x16xf32>
    %70 = arith.subf %68, %69 : vector<2x16xf32>
    %cst_28 = arith.constant 0.564189613 : f32
    %71 = vector.broadcast %cst_28 : f32 to vector<2x16xf32>
    %72 = arith.mulf %67, %71 : vector<2x16xf32>
    %c5 = arith.constant 5 : index
    %c0_29 = arith.constant 0 : index
    %c0_30 = arith.constant 0 : index
    %73 = vector.load %arg3[%c5, %c0_29, %c0_30] : memref<11x2x16xf32, #tpu.memory_space<vmem>>, vector<1x2x16xf32>
    %74 = vector.shape_cast %73 : vector<1x2x16xf32> to vector<2x16xf32>
    %75 = vector.shape_cast %72 : vector<2x16xf32> to vector<1x2x16xf32>
    tpu.vector_store %arg3[%c5, %c0_29, %c0_30], %75 {strides = array<i32>} : memref<11x2x16xf32, #tpu.memory_space<vmem>>, vector<1x2x16xf32>,
    %cst_31 = arith.constant 0.564189613 : f32
    %76 = vector.broadcast %cst_31 : f32 to vector<2x16xf32>
    %77 = arith.mulf %70, %76 : vector<2x16xf32>
    %c10 = arith.constant 10 : index
    %c0_32 = arith.constant 0 : index
    %c0_33 = arith.constant 0 : index
    %78 = vector.load %arg3[%c10, %c0_32, %c0_33] : memref<11x2x16xf32, #tpu.memory_space<vmem>>, vector<1x2x16xf32>
    %79 = vector.shape_cast %78 : vector<1x2x16xf32> to vector<2x16xf32>
    %80 = vector.shape_cast %77 : vector<2x16xf32> to vector<1x2x16xf32>
    tpu.vector_store %arg3[%c10, %c0_32, %c0_33], %80 {strides = array<i32>} : memref<11x2x16xf32, #tpu.memory_space<vmem>>, vector<1x2x16xf32>,
    return
  }
  func.func @transform_0(%arg0: i32) -> i32 {
    %c0_i32 = arith.constant 0 : i32
    %c0_i32_0 = arith.constant 0 : i32
    return %c0_i32 : i32
  }
  func.func @transform_1(%arg0: i32) -> (i32, i32) {
    %c0_i32 = arith.constant 0 : i32
    %c0_i32_0 = arith.constant 0 : i32
    return %arg0, %c0_i32 : i32, i32
  }
  func.func @transform_2(%arg0: i32) -> (i32, i32, i32) {
    %c0_i32 = arith.constant 0 : i32
    %c0_i32_0 = arith.constant 0 : i32
    %c0_i32_1 = arith.constant 0 : i32
    return %c0_i32, %arg0, %c0_i32_0 : i32, i32, i32
  }
}

</mosaic_0001>

<bundles_post_ra>
// kernel: tpu_custom_call.1
= control target key start
LH: loop header
LB: loop body
LE: loop exit
PB: predicated region body
PF: predicated region fallthrough
CT: control target
= control target key end

     0   :  { %7 = vsyncpa [#allocation4], 0  ;;  %s451_s0 = inlined_call_operand.hbm [shape: f32[5], index: 0, kind: input, shape index: {}]   ;;  %s452_s1 = inlined_call_operand.vmem [shape: f32[2,16], index: 1, kind: input, shape index: {}]   ;;  %s453_s2 = inlined_call_operand.hbm [shape: f32[11,2,16], index: 2, kind: output, shape index: {}]  }
   0x1   :  { %8 = vsyncpa [#allocation3], 0  ;;  %s330_s11 = scalar_lea.hbm %s451_s0, 16 }
   0x2   :  { %p331_p0 = scmp.ne.s32.totalorder %s451_s0, %s330_s11  ;;  %p334_p1 = scmp.lt.u32.totalorder %s330_s11, %s451_s0 }
   0x4   :  { %p336_p2 = pnand %p334_p1, %p331_p0 }
   0x6   :  { %339 = shalt.err (!%p336_p2)
}
   0x7   :  { %s366_s16 = smov [#allocation2]  }
   0x8   :  { %16 = dma.hbm_to_smem %s451_s0, 16, %s366_s16, [#allocation4]  }
   0x9   :  { %362 = dma.done.wait [#allocation4], 16  }
   0xa   :  { %363 = vsyncadd [#allocation4], 4294967280 }
   0xb   :  { %22 = sfence }
   0xc   :  { %vm24_vm0 = vcmask 123904   ;;  %v407_v0 = vld [vmem:[%s452_s1] sm:$0x3]  ;;  %v367_v1 = vmov 0.3989423   ;;  %s374_s0 = smov [#allocation5]  }
   0xd   :  { %25 = vst.msk [vmem:[#allocation5] sm:$0x3] %vm24_vm0, %v367_v1  ;;  %v29_v2 = vand.u32 2139095040, %v407_v0  ;;  %v26_v4 = vand.u32 2147483647, %v407_v0  ;;  %vm28_vm8 = vcmp.lt.s32.totalorder %v407_v0, 0 }
   0xe   :  { %v368_v13 = vmov 683565275   ;;  %v369_v15 = vmov 2475754826   ;;  %v370_v17 = vmov 2131351028  }
   0xf   :  { %v30_v3 = vshrl.u32 %v29_v2, 23  ;;  %v33_v7 = vand.u32 8388607, %v26_v4  ;;  %v371_v19 = vmov 2102212464   ;;  %s291_s1 = sshll.u32 %s374_s0, 4  ;;  %s292_s1 = int_to_ptr.vmem [resolvable:$true] %s291_s1 }
  0x10   :  { %v372_v21 = vmov 920167782   ;;  %v373_v28 = vmov 1326507024   ;;  %vm27_vm9 = vcmp.le.f32.partialorder %v26_v4, 0.7853982  ;;  %p345_p4 = scmp.lt.s32.totalorder %s292_s1, %s292_s1 }
  0x11   :  { %v303_v5 = vadd.s32 4294967169, %v30_v3  ;;  %v34_v10 = vor.u32 8388608, %v33_v7  ;;  %s340_s21 = scalar_lea.vmem %s292_s1, 352 }
  0x12   :  { %p341_p3 = scmp.ne.s32.totalorder %s292_s1, %s340_s21  ;;  %p346_p5 = scmp.lt.s32.totalorder %s340_s21, %s340_s21 }
  0x13   :  { %v36_v6 = vadd.s32 1, %v303_v5  ;;  %v74_v30 = vshll.u32 %v34_v10, 8 }
  0x14   :  { %p347_p6 = por %p346_p5, %p345_p4 }
  0x15   :  { %vm37_vm1 = vcmp.gt.s32.totalorder %v36_v6, 0 }
  0x16   :  { %v38_v8 = vsel %vm37_vm1, %v36_v6, 0  ;;  %vm118_vm1 = vweird.f32 %v407_v0  ;;  %p348_p7 = pnand %p347_p6, %p341_p3 }
  0x17   :  { %v40_v9 = vand.u32 31, %v38_v8  ;;  %v39_v11 = vshrl.u32 %v38_v8, 5 }
  0x19   :  { %v41_v12 = vsub.s32 32, %v40_v9  ;;  %v43_v14 = vshll.u32 %v368_v13, %v40_v9  ;;  %v46_v16 = vshll.u32 %v369_v15, %v40_v9  ;;  %v49_v18 = vshll.u32 %v370_v17, %v40_v9 }
  0x1a   :  { %v52_v20 = vshll.u32 %v371_v19, %v40_v9  ;;  %v55_v22 = vshll.u32 %v372_v21, %v40_v9  ;;  %vm58_vm2 = vcmp.lt.s32.totalorder %v39_v11, 1  ;;  %vm61_vm3 = vcmp.lt.s32.totalorder %v39_v11, 4 }
  0x1b   :  { %v42_v23 = vshrl.u32 %v368_v13, %v41_v12  ;;  %v44_v24 = vshrl.u32 %v369_v15, %v41_v12  ;;  %v47_v25 = vshrl.u32 %v370_v17, %v41_v12  ;;  %v50_v26 = vshrl.u32 %v371_v19, %v41_v12 }
  0x1c   :  { %v53_v27 = vshrl.u32 %v372_v21, %v41_v12  ;;  %v56_v29 = vshrl.u32 %v373_v28, %v41_v12  ;;  %vm59_vm4 = vcmp.lt.s32.totalorder %v39_v11, 2  ;;  %vm60_vm5 = vcmp.lt.s32.totalorder %v39_v11, 3 }
  0x1d   :  { %v45_v31 = vor.u32 %v44_v24, %v43_v14  ;;  %v48_v32 = vor.u32 %v47_v25, %v46_v16  ;;  %v51_v33 = vor.u32 %v50_v26, %v49_v18 }
  0x1e   :  { %v54_v34 = vor.u32 %v53_v27, %v52_v20  ;;  %v57_v35 = vor.u32 %v56_v29, %v55_v22 }
  0x1f   :  { %v62_v36 = vsel %vm58_vm2, %v42_v23, %v45_v31  ;;  %v63_v37 = vsel %vm61_vm3, %v51_v33, 2102212464  ;;  %v66_v38 = vsel %vm58_vm2, %v45_v31, %v48_v32  ;;  %v70_v39 = vsel %vm58_vm2, %v48_v32, %v51_v33 }
  0x20   :  { %v64_v40 = vsel %vm60_vm5, %v48_v32, %v63_v37  ;;  %v67_v41 = vsel %vm61_vm3, %v54_v34, 920167782  ;;  %v71_v42 = vsel %vm61_vm3, %v57_v35, 1326507024 }
  0x21   :  { %v68_v43 = vsel %vm60_vm5, %v51_v33, %v67_v41  ;;  %v72_v44 = vsel %vm60_vm5, %v54_v34, %v71_v42  ;;  %v65_v45 = vsel %vm59_vm4, %v62_v36, %v64_v40 }
  0x22   :  { %v69_v46 = vsel %vm59_vm4, %v66_v38, %v68_v43  ;;  %v73_v47 = vsel %vm59_vm4, %v70_v39, %v72_v44  ;;  %v81_v52 = vmul.u32 %v74_v30, %v65_v45 }
  0x23   :  { %v414_v48 = vmul.u32.u64.low %v74_v30, %v73_v47  ;;  %v415_v49 = vmul.u32.u64.high %v74_v30, %v73_v47, %v414_v48  ;;  %v417_v50 = vmul.u32.u64.low %v74_v30, %v69_v46  ;;  %v418_v51 = vmul.u32.u64.high %v74_v30, %v69_v46, %v417_v50 }
  0x25   :  { %vm83_vm6 = vc.u32 %v415_v49, %v417_v50  ;;  %v84_v53 = vadd.s32 1, %v418_v51  ;;  %v82_v1 = vadd.s32 %v417_v50, %v415_v49 }
  0x27   :  { %v85_v54 = vsel %vm83_vm6, %v84_v53, %v418_v51 }
  0x28   :  { %v86_v55 = vadd.s32 %v85_v54, %v81_v52 }
  0x2a   :  { %v87_v56 = vadd.s32 536870912, %v86_v55 }
  0x2c   :  { %v88_v57 = vshrl.u32 %v87_v56, 30 }
  0x2e   :  { %v89_v58 = vshll.u32 %v88_v57, 30  ;;  %v112_v14 = vsub.s32 4, %v88_v57 }
  0x30   :  { %v90_v59 = vsub.s32 %v86_v55, %v89_v58  ;;  %v113_v17 = vsel %vm28_vm8, %v112_v14, %v88_v57 }
  0x31   :  { %v115_v20 = vsel %vm27_vm9, 0, %v113_v17 }
  0x32   :  { %v92_v60 = vsub.s32 0, %v90_v59  ;;  %v119_v21 = vadd.s32 3, %v115_v20  ;;  %v223_v23 = vand.u32 3, %v115_v20 }
  0x34   :  { %v304_v61 = vmin.u32 %v92_v60, %v90_v59  ;;  %v120_v22 = vand.u32 3, %v119_v21  ;;  %vm228_vm11 = vcmp.eq.s32.totalorder %v223_v23, 2  ;;  %vm225_vm13 = vcmp.eq.s32.totalorder %v223_v23, 0 }
  0x35   :  { %vm224_vm15 = vcmp.lt.s32.totalorder %v223_v23, 2 }
  0x36   :  { %v94_v62 = vclz %v304_v61  ;;  %vm125_vm10 = vcmp.eq.s32.totalorder %v120_v22, 2  ;;  %vm122_vm12 = vcmp.eq.s32.totalorder %v120_v22, 0  ;;  %vm121_vm14 = vcmp.lt.s32.totalorder %v120_v22, 2 }
  0x38   :  { %v305_v63 = vadd.s32 4294967294, %v94_v62 }
  0x3a   :  { %vm306_vm7 = vcmp.lt.s32.totalorder %v305_v63, 0 }
  0x3b   :  { %v97_v2 = vsel %vm306_vm7, 0, %v305_v63 }
  0x3c   :  { %v98_v3 = vsub.s32 32, %v97_v2  ;;  %v99_v5 = vshll.u32 %v90_v59, %v97_v2  ;;  %v102_v6 = vsub.s32 4294967266, %v97_v2 }
  0x3e   :  { %v100_v7 = vshrl.u32 %v82_v1, %v98_v3  ;;  %v103_v8 = vadd.s32 127, %v102_v6 }
  0x40   :  { %v101_v9 = vor.u32 %v100_v7, %v99_v5  ;;  %v104_v10 = vshll.u32 %v103_v8, 23 }
  0x42   :  { %v105_v11 = vor.u32 4788187, %v104_v10  ;;  %v108_v12 = vcvt.s32.f32 %v101_v9 }
  0x44   :  { %v106_v13 = vand.u32 2147483647, %v105_v11 }
  0x46   :  { %v109_v15 = vmul.f32 %v108_v12, %v106_v13 }
  0x48   :  { %v110_v16 = vxor.u32 2147483648, %v109_v15 }
  0x4a   :  { %v111_v18 = vsel %vm28_vm8, %v110_v16, %v109_v15 }
  0x4b   :  { %v114_v19 = vsel %vm27_vm9, %v407_v0, %v111_v18 }
  0x4c   :  { %326 = vcosq.f32 %v114_v19 }
  0x4d   :  { %328 = vsinq.f32 %v114_v19 }
  0x56   :  { %v327_v24 = vpop.eup %326 }
  0x57   :  { %v329_v25 = vpop.eup %328  ;;  %v126_v26 = vxor.u32 2147483648, %v327_v24 }
  0x58   :  { %v123_v4 = vxor.u32 2147483648, %v329_v25 }
  0x59   :  { %v127_v27 = vsel %vm125_vm10, %v126_v26, %v329_v25  ;;  %v230_v28 = vsel %vm228_vm11, %v126_v26, %v329_v25 }
  0x5a   :  { %v124_v29 = vsel %vm122_vm12, %v327_v24, %v123_v4  ;;  %v227_v30 = vsel %vm225_vm13, %v327_v24, %v123_v4 }
  0x5b   :  { %v128_v31 = vsel %vm121_vm14, %v124_v29, %v127_v27  ;;  %v231_v32 = vsel %vm224_vm15, %v227_v30, %v230_v28 }
  0x5c   :  { %v129_v33 = vsel %vm118_vm1, nan, %v128_v31  ;;  %v232_v34 = vsel %vm118_vm1, nan, %v231_v32 }
  0x5d   :  { %v233_v35 = vmul.f32 0.5641896, %v129_v33  ;;  %v236_v36 = vmul.f32 0.5641896, %v232_v34  ;;  %v239_v37 = vmul.f32 %v232_v34, %v129_v33  ;;  %v241_v38 = vmul.f32 %v232_v34, %v232_v34 }
  0x5e   :  { %v242_v39 = vmul.f32 %v129_v33, %v129_v33 }
  0x5f   :  { %235 = vst.msk [vmem:[#allocation5 + $0x2] sm:$0x3] %vm24_vm0, %v233_v35  ;;  %238 = vst.msk [vmem:[#allocation5 + $0xc] sm:$0x3] %vm24_vm0, %v236_v36  ;;  %v240_v40 = vadd.f32 %v239_v37, %v239_v37 }
  0x60   :  { %v243_v41 = vsub.f32 %v241_v38, %v242_v39 }
  0x61   :  { %v244_v0 = vmul.f32 0.5641896, %v240_v40  ;;  %v250_v42 = vmul.f32 %v240_v40, %v232_v34  ;;  %v254_v43 = vmul.f32 %v240_v40, %v129_v33 }
  0x62   :  { %v247_v44 = vmul.f32 0.5641896, %v243_v41  ;;  %v251_v45 = vmul.f32 %v243_v41, %v129_v33  ;;  %v253_v46 = vmul.f32 %v243_v41, %v232_v34 }
  0x63   :  { %246 = vst.msk [vmem:[#allocation5 + $0x4] sm:$0x3] %vm24_vm0, %v244_v0 }
  0x64   :  { %249 = vst.msk [vmem:[#allocation5 + $0xe] sm:$0x3] %vm24_vm0, %v247_v44  ;;  %v252_v47 = vadd.f32 %v251_v45, %v250_v42  ;;  %v255_v48 = vsub.f32 %v253_v46, %v254_v43 }
  0x66   :  { %v256_v49 = vmul.f32 0.5641896, %v252_v47  ;;  %v259_v50 = vmul.f32 0.5641896, %v255_v48  ;;  %v262_v51 = vmul.f32 %v252_v47, %v232_v34  ;;  %v263_v52 = vmul.f32 %v255_v48, %v129_v33 }
  0x67   :  { %v265_v53 = vmul.f32 %v255_v48, %v232_v34  ;;  %v266_v54 = vmul.f32 %v252_v47, %v129_v33 }
  0x68   :  { %258 = vst.msk [vmem:[#allocation5 + $0x6] sm:$0x3] %vm24_vm0, %v256_v49  ;;  %261 = vst.msk [vmem:[#allocation5 + $0x10] sm:$0x3] %vm24_vm0, %v259_v50  ;;  %v264_v55 = vadd.f32 %v263_v52, %v262_v51 }
  0x69   :  { %v267_v56 = vsub.f32 %v265_v53, %v266_v54 }
  0x6a   :  { %v268_v57 = vmul.f32 0.5641896, %v264_v55  ;;  %v274_v58 = vmul.f32 %v264_v55, %v232_v34  ;;  %v278_v59 = vmul.f32 %v264_v55, %v129_v33 }
  0x6b   :  { %v271_v60 = vmul.f32 0.5641896, %v267_v56  ;;  %v275_v61 = vmul.f32 %v267_v56, %v129_v33  ;;  %v277_v62 = vmul.f32 %v267_v56, %v232_v34 }
  0x6c   :  { %270 = vst.msk [vmem:[#allocation5 + $0x8] sm:$0x3] %vm24_vm0, %v268_v57 }
  0x6d   :  { %273 = vst.msk [vmem:[#allocation5 + $0x12] sm:$0x3] %vm24_vm0, %v271_v60  ;;  %v276_v63 = vadd.f32 %v275_v61, %v274_v58  ;;  %v279_v1 = vsub.f32 %v277_v62, %v278_v59 }
  0x6f   :  { %v280_v2 = vmul.f32 0.5641896, %v276_v63  ;;  %v283_v3 = vmul.f32 0.5641896, %v279_v1 }
  0x71   :  { %282 = vst.msk [vmem:[#allocation5 + $0xa] sm:$0x3] %vm24_vm0, %v280_v2  ;;  %285 = vst.msk [vmem:[#allocation5 + $0x14] sm:$0x3] %vm24_vm0, %v283_v3 }
  0x72   :  { %351 = shalt.err (!%p348_p7)
}
  0x73   :  { %s352_s24 = scalar_lea.hbm %s453_s2, 352 }
  0x74   :  { %p353_p8 = scmp.ne.s32.totalorder %s453_s2, %s352_s24  ;;  %p356_p9 = scmp.lt.u32.totalorder %s352_s24, %s453_s2 }
  0x76   :  { %p358_p10 = pnand %p356_p9, %p353_p8 }
  0x78   :  { %361 = shalt.err (!%p358_p10)
}
  0x79   :  { %s375_s29 = smov 32   ;;  %s376_s30 = smov 2  }
  0x7a   :  { %297 = dma.vmem_to_hbm [thread:$0]  %s292_s1, 352, %s453_s2, [#allocation3], %s375_s29, %s375_s29, %s376_s30  }
  0x7b   :  { %364 = dma.done.wait [#allocation3], 352  }
  0x7c   :  { %365 = vsyncadd [#allocation3], 4294966944 }
  0x7d   :  { %301 = vsyncpa [#allocation3], 1 }
  0x7e   :  { %302 = vsyncpa [#allocation4], 1 }

</bundles_post_ra>
